<compile_context>
chip_gen: v5e
topology: v5e:2x2
jax: 0.10.0
libtpu: 0.0.40
codegen_flags: <defaults>
</compile_context>

<pallas_src>
import functools

import jax
import jax.numpy as jnp
from jax.experimental import pallas as pl
from jax.experimental.pallas import tpu as pltpu


def make_positional_encoding(max_len, d_model, dtype=jnp.float32):
    """Same buffer the PyTorch module builds in __init__: shape (max_len, d_model)."""
    position = jnp.arange(max_len, dtype=jnp.float32)[:, None]
    div_term = 1.0 / (10000.0 ** (jnp.arange(0, d_model, 2, dtype=jnp.float32) / d_model))
    angles = position * div_term                       # (max_len, d_model//2)
    pe = jnp.zeros((max_len, d_model), dtype=jnp.float32)
    pe = pe.at[:, 0::2].set(jnp.sin(angles))
    pe = pe.at[:, 1::2].set(jnp.cos(angles))
    return pe.astype(dtype)


# ---------------- kernels (pure streaming / elementwise) ----------------

def _pe_eval_kernel(x_ref, pe_ref, o_ref):
    # x_ref: (tile_b, tile_n); pe_ref: (1, tile_n) -> broadcast over batch rows.
    o_ref[...] = (x_ref[...] + pe_ref[...]).astype(o_ref.dtype)


def _pe_train_kernel(x_ref, pe_ref, bits_ref, o_ref, *, threshold, scale):
    val = x_ref[...] + pe_ref[...]
    keep = bits_ref[...] >= jnp.uint32(threshold)       # P(keep) = 1 - p
    val = jnp.where(keep, val * jnp.asarray(scale, val.dtype), jnp.zeros_like(val))
    o_ref[...] = val.astype(o_ref.dtype)


# ---------------- tiling ----------------

def _choose_tiles(B, N, itemsize, budget_bytes=1 << 20):
    """Pick (tile_b, tile_n) for the flattened (B, N) view.

    Block stays <= budget_bytes; last dim is a multiple of 128 (or the full
    axis), sublane dim a multiple of 8 (or the full batch).  Partial edge
    blocks are handled by pl.cdiv, so odd sizes never shrink the tile.
    """
    if B * N * itemsize <= budget_bytes:
        return B, N                                   # one block covers everything
    tile_b = B
    tile_n = (budget_bytes // (tile_b * itemsize)) // 128 * 128
    if tile_n < 128:
        # batch too large for a full-batch block: tile batch too.
        tile_n = 128
        tile_b = (budget_bytes // (tile_n * itemsize)) // 8 * 8
        tile_b = max(8, min(tile_b, B))
    tile_n = min(tile_n, N)
    return tile_b, tile_n


# ---------------- wrapper ----------------

def positional_encoding_forward(x, pe, *, dropout_p=0.1, train=False, rng_key=None):
    """x: (B, S, D); pe: (max_len, D).  Returns dropout(x + pe[:S])."""
    B, S, D = x.shape
    assert pe.shape[0] >= S and pe.shape[1] == D
    N = S * D

    # Flatten to a lane-dense 2-D layout; pe broadcasts over the batch rows.
    x2 = x.reshape(B, N)
    pe2 = pe[:S].astype(x.dtype).reshape(1, N)

    itemsize = jnp.dtype(x.dtype).itemsize
    tile_b, tile_n = _choose_tiles(B, N, itemsize)
    # Batch innermost -> pe block index is invariant along the inner axis, so
    # Pallas fetches each pe column tile exactly once.
    grid = (pl.cdiv(N, tile_n), pl.cdiv(B, tile_b))

    x_spec = pl.BlockSpec((tile_b, tile_n), lambda j, b: (b, j))
    pe_spec = pl.BlockSpec((1, tile_n), lambda j, b: (0, j))
    out_spec = pl.BlockSpec((tile_b, tile_n), lambda j, b: (b, j))
    cparams = pltpu.CompilerParams(dimension_semantics=("parallel", "parallel"))
    out_shape = jax.ShapeDtypeStruct((B, N), x.dtype)

    use_dropout = bool(train) and float(dropout_p) > 0.0
    if use_dropout:
        assert 0.0 <= dropout_p < 1.0, "dropout_p must be in [0, 1)"
        if rng_key is None:
            rng_key = jax.random.PRNGKey(0)
        bits = jax.random.bits(rng_key, (B, N), dtype=jnp.uint32)
        threshold = min(int(float(dropout_p) * (2 ** 32)), 2 ** 32 - 1)
        scale = 1.0 / (1.0 - float(dropout_p))
        kernel = functools.partial(_pe_train_kernel, threshold=threshold, scale=scale)
        out2 = pl.pallas_call(
            kernel,
            out_shape=out_shape,
            grid=grid,
            in_specs=[x_spec, pe_spec,
                      pl.BlockSpec((tile_b, tile_n), lambda j, b: (b, j))],
            out_specs=out_spec,
            compiler_params=cparams,
        )(x2, pe2, bits)
    else:
        out2 = pl.pallas_call(
            _pe_eval_kernel,
            out_shape=out_shape,
            grid=grid,
            in_specs=[x_spec, pe_spec],
            out_specs=out_spec,
            compiler_params=cparams,
        )(x2, pe2)

    return out2.reshape(B, S, D)


def positional_encoding_ref(x, pe):
    """Pure-JAX reference (eval mode: dropout is identity)."""
    return x + pe[: x.shape[1]][None, :, :].astype(x.dtype)


if __name__ == "__main__":
    key = jax.random.PRNGKey(0)
    k_x, k_drop = jax.random.split(key)

    B, S, D = 2, 8, 32            # batch=2, seq=8, d_model=32
    max_len = 64
    dropout_p = 0.1

    x = jax.random.normal(k_x, (B, S, D), dtype=jnp.float32)
    pe = make_positional_encoding(max_len, D, dtype=jnp.float32)

    # ---- eval mode (dropout = identity): exact check vs reference ----
    out = positional_encoding_forward(x, pe, dropout_p=dropout_p, train=False)
    out = jax.block_until_ready(out)
    ref = positional_encoding_ref(x, pe)
    assert out.shape == (B, S, D)
    assert jnp.allclose(out, ref, rtol=1e-6, atol=1e-6), \
        float(jnp.max(jnp.abs(out - ref)))

    # ---- train mode: inverted dropout with host-generated random bits ----
    out_t = positional_encoding_forward(x, pe, dropout_p=dropout_p,
                                        train=True, rng_key=k_drop)
    out_t = jax.block_until_ready(out_t)
    assert out_t.shape == (B, S, D)
    n_zero = int(jnp.sum(out_t == 0.0))
    # p=0.1 over 512 elements: essentially guaranteed to drop some, keep most.
    assert 0 < n_zero < out_t.size // 2, n_zero
    kept = out_t != 0.0
    expected_kept = ref * jnp.float32(1.0 / (1.0 - dropout_p))
    assert jnp.allclose(jnp.where(kept, out_t, 0.0),
                        jnp.where(kept, expected_kept, 0.0),
                        rtol=1e-5, atol=1e-5)

    print("KERNEL_OK")
</pallas_src>

<mosaic_0001>
module attributes {stable_mosaic.version = 11 : i64} {
  func.func @_pe_eval_kernel(%arg0: i32, %arg1: i32, %arg2: memref<2x256xf32, #tpu.memory_space<vmem>>, %arg3: memref<1x256xf32, #tpu.memory_space<vmem>>, %arg4: memref<2x256xf32, #tpu.memory_space<vmem>>) attributes {dimension_semantics = [#tpu.dimension_semantics<parallel>, #tpu.dimension_semantics<parallel>], iteration_bounds = array<i64: 1, 1>, scalar_prefetch = 0 : i64, scratch_operands = 0 : i64, tpu.core_type = #tpu.core_type<tc>, window_params = [{transform_indices = @transform_0, window_bounds = array<i64: 2, 256>}, {transform_indices = @transform_1, window_bounds = array<i64: 1, 256>}, {transform_indices = @transform_2, window_bounds = array<i64: 2, 256>}]} {
    %c0 = arith.constant 0 : index
    %c0_0 = arith.constant 0 : index
    %0 = vector.load %arg2[%c0, %c0_0] : memref<2x256xf32, #tpu.memory_space<vmem>>, vector<2x256xf32>
    %c0_1 = arith.constant 0 : index
    %c0_2 = arith.constant 0 : index
    %1 = vector.load %arg3[%c0_1, %c0_2] : memref<1x256xf32, #tpu.memory_space<vmem>>, vector<1x256xf32>
    %2 = vector.broadcast %1 : vector<1x256xf32> to vector<2x256xf32>
    %3 = arith.addf %0, %2 : vector<2x256xf32>
    %c0_3 = arith.constant 0 : index
    %c0_4 = arith.constant 0 : index
    %4 = vector.load %arg4[%c0_3, %c0_4] : memref<2x256xf32, #tpu.memory_space<vmem>>, vector<2x256xf32>
    tpu.vector_store %arg4[%c0_3, %c0_4], %3 {strides = array<i32>} : memref<2x256xf32, #tpu.memory_space<vmem>>, vector<2x256xf32>,
    return
  }
  func.func @transform_0(%arg0: i32, %arg1: i32) -> (i32, i32) {
    %c0_i32 = arith.constant 0 : i32
    return %arg1, %arg0 : i32, i32
  }
  func.func @transform_1(%arg0: i32, %arg1: i32) -> (i32, i32) {
    %c0_i32 = arith.constant 0 : i32
    %c0_i32_0 = arith.constant 0 : i32
    return %c0_i32, %arg0 : i32, i32
  }
  func.func @transform_2(%arg0: i32, %arg1: i32) -> (i32, i32) {
    %c0_i32 = arith.constant 0 : i32
    return %arg1, %arg0 : i32, i32
  }
}

</mosaic_0001>

<bundles_post_ra>
// kernel: tpu_custom_call.1
= control target key start
LH: loop header
LB: loop body
LE: loop exit
PB: predicated region body
PF: predicated region fallthrough
CT: control target
= control target key end

     0   :  { %7 = vsyncpa [#allocation3], 0  ;;  %s177_s0 = inlined_call_operand.hbm [shape: f32[2,256], index: 0, kind: input, shape index: {}]   ;;  %s178_s1 = inlined_call_operand.hbm [shape: f32[1,256], index: 1, kind: input, shape index: {}]   ;;  %s179_s2 = inlined_call_operand.hbm [shape: f32[2,256], index: 2, kind: output, shape index: {}]  }
   0x1   :  { %8 = vsyncpa [#allocation6], 0 }
   0x2   :  { %9 = vsyncpa [#allocation4], 0  ;;  %s15_s11 = sshll.u32 %s177_s0, 4  ;;  %s150_s12 = smov [#allocation2]   ;;  %s16_s11 = int_to_ptr.hbm [resolvable:$true] %s15_s11 }
   0x3   :  { %s17_s13 = sshll.u32 %s150_s12, 4  ;;  %s26_s16 = sshll.u32 %s178_s1, 4  ;;  %s18_s13 = int_to_ptr.vmem [resolvable:$true] %s17_s13  ;;  %s27_s16 = int_to_ptr.hbm [resolvable:$true] %s26_s16 }
   0x4   :  { %20 = dma.hbm_to_vmem [thread:$0]  %s16_s11, 64, %s18_s13, [#allocation3]  }
   0x5   :  { %s151_s17 = smov [#allocation5]  }
   0x6   :  { %s28_s18 = sshll.u32 %s151_s17, 4  ;;  %s29_s18 = int_to_ptr.vmem [resolvable:$true] %s28_s18 }
   0x7   :  { %31 = dma.hbm_to_vmem [thread:$0]  %s27_s16, 32, %s29_s18, [#allocation6]  }
   0x8   :  { %144 = dma.done.wait [#allocation3], 64  }
   0x9   :  { %145 = vsyncadd [#allocation3], 4294967232 }
   0xa   :  { %146 = dma.done.wait [#allocation6], 32  }
   0xb   :  { %147 = vsyncadd [#allocation6], 4294967264  ;;  %v41_v0 = vld [vmem:[#allocation5] sm:$0x3]  ;;  %vm46_vm0 = vcmask 1041408   ;;  %s152_s0 = smov [#allocation7]  }
   0xc   :  { %v43_v1 = vperm.slane %v41_v0, 0  ;;  %v44_v2 = vperm.slane %v41_v0, 1  ;;  %v40_v3 = vld [vmem:[#allocation2] sm:$0xf]  ;;  %s56_s19 = sshll.u32 %s152_s0, 4  ;;  %s58_s21 = sshll.u32 %s179_s2, 4  ;;  %s57_s19 = int_to_ptr.vmem [resolvable:$true] %s56_s19  ;;  %s59_s21 = int_to_ptr.hbm [resolvable:$true] %s58_s21 }
   0xe   :  { %v45_v4 = vrot.slane %v44_v2, 6 }
  0x10   :  { %v47_v5 = vsel %vm46_vm0, %v43_v1, %v45_v4 }
  0x11   :  { %v49_v6 = vadd.f32 %v47_v5, %v40_v3 }
  0x13   :  { %50 = vst [vmem:[#allocation7] sm:$0xf] %v49_v6 }
  0x14   :  { %61 = dma.vmem_to_hbm [thread:$0]  %s57_s19, 64, %s59_s21, [#allocation4]  }
  0x15   :  { %148 = dma.done.wait [#allocation4], 64  }
  0x16   :  { %149 = vsyncadd [#allocation4], 4294967232 }
  0x17   :  { %66 = vsyncpa [#allocation3], 1 }
  0x18   :  { %67 = vsyncpa [#allocation6], 1 }
  0x19   :  { %68 = vsyncpa [#allocation4], 1 }

</bundles_post_ra>
